<compile_context>
chip_gen: v7x
topology: tpu7x:2x2x1
jax: 0.10.0
libtpu: 0.0.40
codegen_flags: <defaults>
</compile_context>

<pallas_src>
import functools

import jax
import jax.numpy as jnp
from jax.experimental import pallas as pl
from jax.experimental.pallas import tpu as pltpu

QMIN, QMAX = -128, 127          # qint8 range


def _device_kind():
    try:
        return jax.devices()[0].device_kind.lower()
    except Exception:
        return ""


_KIND = _device_kind()
# v7x: two TensorCores, bf16-only MXU.  v5e/v5p/v6e: native int8 MXU path.
_IS_2TC = ("v7" in _KIND) or ("7x" in _KIND)
_HAS_INT8_MXU = (not _IS_2TC) and (("v5" in _KIND) or ("v6" in _KIND))
# Elementwise block bytes per operand: bigger blocks amortize the ~0.35us/step
# overhead; 3 operands x 2 buffers must stay under the scoped-VMEM default
# (16 MiB on v5e, 32 MiB on v6e/v7x).
_ROW_TARGET_BYTES = (4 << 20) if (_IS_2TC or ("v6" in _KIND)) else (2 << 20)


# ----------------------------------------------------------------------------
# QTensor container + plain-JAX quantize helper (input construction glue)
# ----------------------------------------------------------------------------
class QTensor:
    def __init__(self, q, scale, zero_point):
        self.q = q                      # int8 values
        self.scale = float(scale)
        self.zero_point = int(zero_point)

    def dequantize(self):
        return (self.q.astype(jnp.float32) - self.zero_point) * self.scale


def quantize_per_tensor(x, scale, zero_point):
    q = jnp.clip(jnp.round(x / scale) + zero_point, QMIN, QMAX)
    return QTensor(q.astype(jnp.int8), scale, zero_point)


def _round_up(v, m):
    return ((v + m - 1) // m) * m


# ----------------------------------------------------------------------------
# Elementwise Pallas kernels (qparams folded into SMEM constants)
# ----------------------------------------------------------------------------
def _q_add_kernel(p_ref, x_ref, y_ref, o_ref, *, relu):
    # out = clip(round(qx*a + qy*b + c')); c' already contains the output
    # zero point, so the relu floor (real-space 0) is zo (= p[3]).
    a, b, c, zo = p_ref[0], p_ref[1], p_ref[2], p_ref[3]
    acc = x_ref[...].astype(jnp.float32) * a + y_ref[...].astype(jnp.float32) * b + c
    if relu:
        acc = jnp.maximum(acc, zo)
    o_ref[...] = jnp.clip(jnp.round(acc), QMIN, QMAX).astype(jnp.int8)


def _q_mul_kernel(p_ref, x_ref, y_ref, o_ref, *, relu):
    # out = clip(round((qx-zx)*(qy-zy)*m + zo)); m = sx*sy/so.
    zx, zy, m, zo = p_ref[0], p_ref[1], p_ref[2], p_ref[3]
    acc = (x_ref[...].astype(jnp.float32) - zx) * \
          (y_ref[...].astype(jnp.float32) - zy) * m + zo
    if relu:
        acc = jnp.maximum(acc, zo)
    o_ref[...] = jnp.clip(jnp.round(acc), QMIN, QMAX).astype(jnp.int8)


def _q_requant_kernel(p_ref, x_ref, o_ref):
    # out = clip(round(qx*g + h')); g = sx/so', h' = (add_c - zx*sx)/so' + zo'.
    g, h = p_ref[0], p_ref[1]
    acc = x_ref[...].astype(jnp.float32) * g + h
    o_ref[...] = jnp.clip(jnp.round(acc), QMIN, QMAX).astype(jnp.int8)


def _q_neg_reflect_kernel(x_ref, o_ref):
    # mul_scalar with negative scalar: q' = -1 - q = ~q (two's complement),
    # a single packed int8 bitwise NOT per vreg -- no int32 widening.
    o_ref[...] = ~x_ref[...]


# ----------------------------------------------------------------------------
# Quantized matmul kernels
# ----------------------------------------------------------------------------
def _q_matmul_i8_kernel(xs_ref, ys_ref, x_ref, y_ref, o_ref, acc_ref, *,
                        zx, zy, k_true, m_scale, zo):
    """int8 MXU path (v5e/v6e): int8 x int8 -> int32 accumulate, analytic
    zero-point correction at the last k step using precomputed row/col sums."""
    k = pl.program_id(2)

    @pl.when(k == 0)
    def _():
        acc_ref[...] = jnp.zeros_like(acc_ref)

    acc_ref[...] += jnp.dot(x_ref[...], y_ref[...],
                            preferred_element_type=jnp.int32)

    @pl.when(k == pl.num_programs(2) - 1)
    def _():
        acc = acc_ref[...]
        if zy != 0:
            acc = acc - zy * xs_ref[...]          # (tm,1) row sums of x
        if zx != 0:
            acc = acc - zx * ys_ref[...]          # (1,tn) col sums of y
        if zx != 0 and zy != 0:
            acc = acc + zx * zy * k_true
        out = acc.astype(jnp.float32) * m_scale + zo
        o_ref[...] = jnp.clip(jnp.round(out), QMIN, QMAX).astype(jnp.int8)


def _q_matmul_bf16_kernel(x_ref, y_ref, o_ref, acc_ref, *, zx, zy, m_scale, zo):
    """bf16 MXU path (v7x / fallback): direct int8->bf16 cast (exact) plus an
    exact bf16 zero-point subtract (skipped when zp == 0), f32 accumulator."""
    k = pl.program_id(2)

    @pl.when(k == 0)
    def _():
        acc_ref[...] = jnp.zeros_like(acc_ref)

    xb = x_ref[...].astype(jnp.bfloat16)
    yb = y_ref[...].astype(jnp.bfloat16)
    if zx != 0:
        xb = xb - zx                              # exact: |q - zp| <= 255 < 256
    if zy != 0:
        yb = yb - zy
    acc_ref[...] += jnp.dot(xb, yb, preferred_element_type=jnp.float32)

    @pl.when(k == pl.num_programs(2) - 1)
    def _():
        out = acc_ref[...] * m_scale + zo
        o_ref[...] = jnp.clip(jnp.round(out), QMIN, QMAX).astype(jnp.int8)


# ----------------------------------------------------------------------------
# Elementwise pallas_call wrapper: lane-dense flattened view + 1-D row grid
# ----------------------------------------------------------------------------
def _to_2d(q):
    """Flatten to (-1, W), W a multiple of 128, padding only if necessary."""
    flat = q.reshape(-1)
    n = flat.shape[0]
    for w in (512, 256, 128):
        if n % w == 0:
            return flat.reshape(-1, w), n
    # TODO(synk): the pad/slice below is an extra HBM pass; mask the ragged
    # tail inside the kernel instead for n % 128 != 0.
    flat = jnp.pad(flat, (0, (-n) % 128))
    return flat.reshape(-1, 128), n


def _from_2d(o2d, n, shape):
    flat = o2d.reshape(-1)
    if flat.shape[0] != n:
        flat = flat[:n]
    return flat.reshape(shape)


def _run_elementwise(kernel, arrs2d, params=None):
    R, W = arrs2d[0].shape
    blk_rows = max(8, ((_ROW_TARGET_BYTES // W) // 8) * 8)
    if _IS_2TC and R >= 32:
        # keep >= 4 grid steps so megacore sharding feeds both TensorCores
        blk_rows = min(blk_rows, max(8, ((-(-R // 4)) // 8) * 8))
    blk_rows = min(blk_rows, R)
    grid = (pl.cdiv(R, blk_rows),)
    tile = pl.BlockSpec((blk_rows, W), lambda i: (i, 0))

    in_specs, inputs = [], []
    if params is not None:
        in_specs.append(pl.BlockSpec(memory_space=pltpu.MemorySpace.SMEM))
        inputs.append(params)
    in_specs += [tile] * len(arrs2d)
    inputs += list(arrs2d)

    n_elem = R * W
    return pl.pallas_call(
        kernel,
        out_shape=jax.ShapeDtypeStruct((R, W), jnp.int8),
        grid=grid,
        in_specs=in_specs,
        out_specs=tile,
        compiler_params=pltpu.CompilerParams(
            dimension_semantics=("parallel",)),
        cost_estimate=pl.CostEstimate(
            flops=6 * n_elem, transcendentals=0,
            bytes_accessed=(len(arrs2d) + 1) * n_elem),
    )(*inputs)


def _pad_axis(q, axis, new_size, fill):
    pad = new_size - q.shape[axis]
    if pad == 0:
        return q
    widths = [(0, 0)] * q.ndim
    widths[axis] = (0, pad)
    return jnp.pad(q, widths, constant_values=fill)


# ----------------------------------------------------------------------------
# QFunctional
# ----------------------------------------------------------------------------
class QFunctionalPallas:
    """Pallas equivalent of torch.ao.nn.quantized.QFunctional.

    `forward` is intentionally unsupported (as in PyTorch); use the named ops.
    activation_post_process is Identity -> no-op.
    """

    def __init__(self):
        self.scale = 1.0
        self.zero_point = 0

    def forward(self, x):
        raise RuntimeError("Functional is not intended to use 'forward'. "
                           "Please use the underlying operation")

    # -- binary quantized ops -------------------------------------------------
    def _binary(self, x: QTensor, y: QTensor, op: str, relu: bool) -> QTensor:
        assert x.q.shape == y.q.shape  # TODO(synk): broadcasting between quantized tensors not implemented
        x2d, n = _to_2d(x.q)
        y2d, _ = _to_2d(y.q)
        inv_so = 1.0 / float(self.scale)
        zo = float(self.zero_point)
        if op == "add":
            a = float(x.scale) * inv_so
            b = float(y.scale) * inv_so
            c = -(x.zero_point * float(x.scale) + y.zero_point * float(y.scale)) * inv_so
            params = jnp.asarray([a, b, c + zo, zo], jnp.float32)  # zo folded into c
            kern = functools.partial(_q_add_kernel, relu=relu)
        else:
            m = float(x.scale) * float(y.scale) * inv_so
            params = jnp.asarray([float(x.zero_point), float(y.zero_point), m, zo],
                                 jnp.float32)
            kern = functools.partial(_q_mul_kernel, relu=relu)
        o2d = _run_elementwise(kern, [x2d, y2d], params)
        return QTensor(_from_2d(o2d, n, x.q.shape), self.scale, self.zero_point)

    def add(self, x, y):
        return self._binary(x, y, "add", relu=False)

    def add_relu(self, x, y):
        return self._binary(x, y, "add", relu=True)

    def mul(self, x, y):
        return self._binary(x, y, "mul", relu=False)

    # -- requantize helper (used by add_scalar saturating branch and cat) -----
    def _requant(self, x: QTensor, target_scale, target_zp, add_c=0.0):
        x2d, n = _to_2d(x.q)
        inv = 1.0 / float(target_scale)
        g = float(x.scale) * inv
        h = (float(add_c) - float(x.zero_point) * float(x.scale)) * inv + float(target_zp)
        params = jnp.asarray([g, h], jnp.float32)
        o2d = _run_elementwise(_q_requant_kernel, [x2d], params)
        return _from_2d(o2d, n, x.q.shape)

    # -- scalar ops (PyTorch qadd_scalar / qmul_scalar qparam rules) ----------
    def add_scalar(self, x: QTensor, c: float) -> QTensor:
        s, z, c = float(x.scale), int(x.zero_point), float(c)
        c_q = int(round(c / s))                       # nearbyint (ties-to-even)
        if QMIN > z - c_q:
            s_p = (QMAX - (z - c_q)) / float(QMAX - QMIN) * s
            z_p = QMIN
        elif QMAX < z - c_q:
            s_p = ((z - c_q) - QMIN) / float(QMAX - QMIN) * s
            z_p = QMAX
        else:
            # int values unchanged, only the quantizer changes
            return QTensor(x.q, s, z - c_q)
        out = self._requant(x, s_p, z_p, add_c=c)
        return QTensor(out, s_p, z_p)

    def mul_scalar(self, x: QTensor, c: float) -> QTensor:
        s, z, c = float(x.scale), int(x.zero_point), float(c)
        if c > 0.0:
            return QTensor(x.q, c * s, z)             # values unchanged
        if c == 0.0:
            return QTensor(jnp.zeros_like(x.q), 1.0, 0)
        # c < 0: pure packed-int8 bitwise reflection q' = ~q = -1 - q
        x2d, n = _to_2d(x.q)
        o2d = _run_elementwise(_q_neg_reflect_kernel, [x2d], None)
        return QTensor(_from_2d(o2d, n, x.q.shape), abs(c) * s,
                       QMAX + QMIN - z)

    # -- cat ------------------------------------------------------------------
    def cat(self, xs, dim=0) -> QTensor:
        outs = []
        for t in xs:
            if (abs(t.scale - float(self.scale)) < 1e-12
                    and t.zero_point == int(self.zero_point)):
                outs.append(t.q)          # already in output quantization
            else:
                outs.append(self._requant(t, self.scale, self.zero_point))
        # TODO(synk): fuse the concat write into the requant kernel's out index_map
        return QTensor(jnp.concatenate(outs, axis=dim), self.scale, self.zero_point)

    # -- matmul ---------------------------------------------------------------
    def matmul(self, x: QTensor, y: QTensor) -> QTensor:
        assert x.q.ndim == 2 and y.q.ndim == 2  # TODO(synk): batched/broadcasted quantized matmul not implemented
        M, K = x.q.shape
        K2, N = y.q.shape
        assert K == K2

        tm = min(512, _round_up(M, 8))
        tn = min(512, _round_up(N, 128))
        tk = min(512, _round_up(K, 128))
        Kp = _round_up(K, tk)      # only K needs padding (accumulation correctness)

        zx, zy = int(x.zero_point), int(y.zero_point)
        m_scale = float(x.scale) * float(y.scale) / float(self.scale)
        zo = float(self.zero_point)
        grid = (pl.cdiv(M, tm), pl.cdiv(N, tn), Kp // tk)
        out_shape = jax.ShapeDtypeStruct((M, N), jnp.int8)
        cparams = pltpu.CompilerParams(
            dimension_semantics=("parallel", "parallel", "arbitrary"))
        cost = pl.CostEstimate(flops=2 * M * N * Kp, transcendentals=0,
                               bytes_accessed=M * Kp + Kp * N + M * N)

        if _HAS_INT8_MXU:
            # Native int8 MXU path; pad K with 0 so padded terms contribute 0.
            xq_p = _pad_axis(x.q, 1, Kp, 0)
            yq_p = _pad_axis(y.q, 0, Kp, 0)
            rowsum_x = (jnp.sum(x.q.astype(jnp.int32), axis=1, keepdims=True)
                        if zy != 0 else jnp.zeros((M, 1), jnp.int32))
            colsum_y = (jnp.sum(y.q.astype(jnp.int32), axis=0, keepdims=True)
                        if zx != 0 else jnp.zeros((1, N), jnp.int32))
            kern = functools.partial(_q_matmul_i8_kernel, zx=zx, zy=zy,
                                     k_true=K, m_scale=m_scale, zo=zo)
            out = pl.pallas_call(
                kern, out_shape=out_shape, grid=grid,
                in_specs=[pl.BlockSpec((tm, 1), lambda i, j, k: (i, 0)),
                          pl.BlockSpec((1, tn), lambda i, j, k: (0, j)),
                          pl.BlockSpec((tm, tk), lambda i, j, k: (i, k)),
                          pl.BlockSpec((tk, tn), lambda i, j, k: (k, j))],
                out_specs=pl.BlockSpec((tm, tn), lambda i, j, k: (i, j)),
                scratch_shapes=[pltpu.VMEM((tm, tn), jnp.int32)],
                compiler_params=cparams, cost_estimate=cost,
            )(rowsum_x, colsum_y, xq_p, yq_p)
        else:
            # bf16 MXU path; pad K with the zero point so (q - zp) == 0 there.
            xq_p = _pad_axis(x.q, 1, Kp, zx)
            yq_p = _pad_axis(y.q, 0, Kp, zy)
            kern = functools.partial(_q_matmul_bf16_kernel, zx=zx, zy=zy,
                                     m_scale=m_scale, zo=zo)
            out = pl.pallas_call(
                kern, out_shape=out_shape, grid=grid,
                in_specs=[pl.BlockSpec((tm, tk), lambda i, j, k: (i, k)),
                          pl.BlockSpec((tk, tn), lambda i, j, k: (k, j))],
                out_specs=pl.BlockSpec((tm, tn), lambda i, j, k: (i, j)),
                scratch_shapes=[pltpu.VMEM((tm, tn), jnp.float32)],
                compiler_params=cparams, cost_estimate=cost,
            )(xq_p, yq_p)
        return QTensor(out, self.scale, self.zero_point)


# ----------------------------------------------------------------------------
# Demo / smoke test
# ----------------------------------------------------------------------------
if __name__ == "__main__":
    key = jax.random.PRNGKey(0)
    kx, ky, ka, kb = jax.random.split(key, 4)

    x = jax.random.normal(kx, (2, 4, 16, 16), jnp.float32)
    y = jax.random.normal(ky, (2, 4, 16, 16), jnp.float32)
    xq = quantize_per_tensor(x, 0.05, 3)
    yq = quantize_per_tensor(y, 0.04, -2)

    qf = QFunctionalPallas()
    # as if calibrated / loaded via _load_from_state_dict
    qf.scale = 0.06
    qf.zero_point = 1

    r_add = qf.add(xq, yq)
    r_add_relu = qf.add_relu(xq, yq)
    r_mul = qf.mul(xq, yq)
    r_add_s = qf.add_scalar(xq, 0.5)
    r_mul_s = qf.mul_scalar(xq, -1.3)
    r_cat = qf.cat([xq, yq], dim=1)

    a = jax.random.normal(ka, (8, 32), jnp.float32)
    b = jax.random.normal(kb, (32, 128), jnp.float32)

    qf_mm = QFunctionalPallas()
    qf_mm.scale = 0.1
    qf_mm.zero_point = -3

    aq0 = quantize_per_tensor(a, 0.05, 0)   # symmetric -> zp==0 fast path
    bq0 = quantize_per_tensor(b, 0.05, 0)
    r_mm0 = qf_mm.matmul(aq0, bq0)

    aq1 = quantize_per_tensor(a, 0.05, 3)   # asymmetric -> zero-point correction path
    bq1 = quantize_per_tensor(b, 0.04, -5)
    r_mm1 = qf_mm.matmul(aq1, bq1)

    for r in (r_add, r_add_relu, r_mul, r_add_s, r_mul_s, r_cat, r_mm0, r_mm1):
        jax.block_until_ready(r.q)

    # --- correctness checks against a pure-JAX reference --------------------
    # Quantized outputs may differ by at most 1 at rounding ties (different
    # float association order / constant folding), so allow |diff| <= 1.
    def requant_ref(v, scale, zp):
        return jnp.clip(jnp.round(v / scale) + zp, QMIN, QMAX).astype(jnp.int32)

    def max_diff(got, ref):
        return int(jnp.max(jnp.abs(got.astype(jnp.int32) - ref.astype(jnp.int32))))

    xd, yd = xq.dequantize(), yq.dequantize()
    assert max_diff(r_add.q, requant_ref(xd + yd, qf.scale, qf.zero_point)) <= 1
    assert max_diff(r_add_relu.q,
                    requant_ref(jnp.maximum(xd + yd, 0.0), qf.scale, qf.zero_point)) <= 1
    assert max_diff(r_mul.q, requant_ref(xd * yd, qf.scale, qf.zero_point)) <= 1

    # add_scalar: non-saturating path -> values unchanged, zero_point shifted
    assert bool((r_add_s.q == xq.q).all())
    assert r_add_s.zero_point == xq.zero_point - int(round(0.5 / xq.scale))

    # mul_scalar (negative scalar): exact integer reflection q' = -1 - q
    ref_refl = ((QMAX + QMIN) - xq.q.astype(jnp.int32)).astype(jnp.int8)
    assert bool((r_mul_s.q == ref_refl).all())
    assert abs(r_mul_s.scale - 1.3 * xq.scale) < 1e-12
    assert r_mul_s.zero_point == (QMAX + QMIN) - xq.zero_point

    # cat: requantized inputs concatenated along dim=1
    assert r_cat.q.shape == (2, 8, 16, 16)
    ref_cat = jnp.concatenate([requant_ref(xd, qf.scale, qf.zero_point),
                               requant_ref(yd, qf.scale, qf.zero_point)], axis=1)
    assert max_diff(r_cat.q, ref_cat) <= 1

    # matmul (symmetric and asymmetric zero points)
    ref_mm0 = requant_ref(jnp.dot(aq0.dequantize(), bq0.dequantize(),
                                  precision="highest"), qf_mm.scale, qf_mm.zero_point)
    ref_mm1 = requant_ref(jnp.dot(aq1.dequantize(), bq1.dequantize(),
                                  precision="highest"), qf_mm.scale, qf_mm.zero_point)
    assert r_mm0.q.shape == (8, 128) and r_mm1.q.shape == (8, 128)
    assert max_diff(r_mm0.q, ref_mm0) <= 1
    assert max_diff(r_mm1.q, ref_mm1) <= 1

    print("KERNEL_OK")
</pallas_src>

<mosaic_0001>
module attributes {stable_mosaic.version = 11 : i64} {
  func.func @_q_add_kernel(%arg0: i32, %arg1: memref<4xf32, #tpu.memory_space<smem>>, %arg2: memref<4x512xi8, #tpu.memory_space<vmem>>, %arg3: memref<4x512xi8, #tpu.memory_space<vmem>>, %arg4: memref<4x512xi8, #tpu.memory_space<vmem>>) attributes {dimension_semantics = [#tpu.dimension_semantics<parallel>], iteration_bounds = array<i64: 1>, scalar_prefetch = 0 : i64, scratch_operands = 0 : i64, tpu.core_type = #tpu.core_type<tc>, window_params = [{transform_indices = @transform_0, window_bounds = array<i64: 4>}, {transform_indices = @transform_1, window_bounds = array<i64: 4, 512>}, {transform_indices = @transform_2, window_bounds = array<i64: 4, 512>}, {transform_indices = @transform_3, window_bounds = array<i64: 4, 512>}]} {
    %c0 = arith.constant 0 : index
    %0 = memref.load %arg1[%c0] : memref<4xf32, #tpu.memory_space<smem>>
    %c1 = arith.constant 1 : index
    %1 = memref.load %arg1[%c1] : memref<4xf32, #tpu.memory_space<smem>>
    %c2 = arith.constant 2 : index
    %2 = memref.load %arg1[%c2] : memref<4xf32, #tpu.memory_space<smem>>
    %c0_0 = arith.constant 0 : index
    %c0_1 = arith.constant 0 : index
    %3 = vector.load %arg2[%c0_0, %c0_1] : memref<4x512xi8, #tpu.memory_space<vmem>>, vector<4x512xi8>
    %4 = arith.sitofp %3 : vector<4x512xi8> to vector<4x512xf32>
    %5 = vector.broadcast %0 : f32 to vector<4x512xf32>
    %6 = arith.mulf %4, %5 : vector<4x512xf32>
    %c0_2 = arith.constant 0 : index
    %c0_3 = arith.constant 0 : index
    %7 = vector.load %arg3[%c0_2, %c0_3] : memref<4x512xi8, #tpu.memory_space<vmem>>, vector<4x512xi8>
    %8 = arith.sitofp %7 : vector<4x512xi8> to vector<4x512xf32>
    %9 = vector.broadcast %1 : f32 to vector<4x512xf32>
    %10 = arith.mulf %8, %9 : vector<4x512xf32>
    %11 = arith.addf %6, %10 : vector<4x512xf32>
    %12 = vector.broadcast %2 : f32 to vector<4x512xf32>
    %13 = arith.addf %11, %12 : vector<4x512xf32>
    %14 = math.roundeven %13 : vector<4x512xf32>
    %c-128_i32 = arith.constant -128 : i32
    %c127_i32 = arith.constant 127 : i32
    %15 = arith.sitofp %c-128_i32 : i32 to f32
    %16 = vector.broadcast %15 : f32 to vector<4x512xf32>
    %17 = arith.maximumf %16, %14 : vector<4x512xf32>
    %18 = arith.sitofp %c127_i32 : i32 to f32
    %19 = vector.broadcast %18 : f32 to vector<4x512xf32>
    %20 = arith.minimumf %19, %17 : vector<4x512xf32>
    %21 = arith.fptosi %20 : vector<4x512xf32> to vector<4x512xi8>
    %c0_4 = arith.constant 0 : index
    %c0_5 = arith.constant 0 : index
    %22 = vector.load %arg4[%c0_4, %c0_5] : memref<4x512xi8, #tpu.memory_space<vmem>>, vector<4x512xi8>
    tpu.vector_store %arg4[%c0_4, %c0_5], %21 {strides = array<i32>} : memref<4x512xi8, #tpu.memory_space<vmem>>, vector<4x512xi8>,
    return
  }
  func.func @transform_0(%arg0: i32) -> i32 {
    %c0_i32 = arith.constant 0 : i32
    %c0_i32_0 = arith.constant 0 : i32
    return %c0_i32 : i32
  }
  func.func @transform_1(%arg0: i32) -> (i32, i32) {
    %c0_i32 = arith.constant 0 : i32
    %c0_i32_0 = arith.constant 0 : i32
    return %arg0, %c0_i32 : i32, i32
  }
  func.func @transform_2(%arg0: i32) -> (i32, i32) {
    %c0_i32 = arith.constant 0 : i32
    %c0_i32_0 = arith.constant 0 : i32
    return %arg0, %c0_i32 : i32, i32
  }
  func.func @transform_3(%arg0: i32) -> (i32, i32) {
    %c0_i32 = arith.constant 0 : i32
    %c0_i32_0 = arith.constant 0 : i32
    return %arg0, %c0_i32 : i32, i32
  }
}

</mosaic_0001>

<bundles_post_ra>
// kernel: tpu_custom_call.1
= control target key start
LH: loop header
LB: loop body
LE: loop exit
PB: predicated region body
PF: predicated region fallthrough
CT: control target
= control target key end

     0   :  { %8 = vsyncpa [#allocation5], 0  ;;  %s277_s0 = inlined_call_operand.hbm [shape: f32[4], index: 0, kind: input, shape index: {}]   ;;  %s278_s1 = inlined_call_operand.hbm [shape: s8[4,512], index: 1, kind: input, shape index: {}]   ;;  %s279_s2 = inlined_call_operand.vmem [shape: s8[4,512], index: 2, kind: input, shape index: {}]   ;;  %s280_s3 = inlined_call_operand.hbm [shape: s8[4,512], index: 3, kind: output, shape index: {}]  }
   0x1   :  { %9 = vsyncpa [#allocation3], 0 }
   0x2   :  { %10 = vsyncpa [#allocation4], 0  ;;  %s154_s14 = scalar_lea.hbm %s277_s0, 16 }
   0x3   :  { %p155_p0 = scmp.ne.s32.totalorder %s277_s0, %s154_s14  ;;  %p158_p1 = scmp.lt.u32.totalorder %s154_s14, %s277_s0 }
   0x5   :  { %p160_p2 = pnand %p158_p1, %p155_p0 }
   0x7   :  { %163 = shalt.err (!%p160_p2)
}
   0x8   :  { %s214_s19 = smov [#allocation2]   ;;  %s215_s22 = smov [#allocation6]  }
   0x9   :  { %18 = dma.hbm_to_smem %s277_s0, 16, %s214_s19, [#allocation5]  }
   0xa   :  { %s25_s23 = sshll.u32 %s215_s22, 4  ;;  %s164_s26 = scalar_lea.hbm %s278_s1, 64  ;;  %s26_s23 = int_to_ptr.vmem [resolvable:$true] %s25_s23 }
   0xb   :  { %p165_p3 = scmp.ne.s32.totalorder %s278_s1, %s164_s26  ;;  %p168_p4 = scmp.lt.u32.totalorder %s164_s26, %s278_s1 }
   0xd   :  { %p170_p5 = pnand %p168_p4, %p165_p3 }
   0xf   :  { %173 = shalt.err (!%p170_p5)
}
  0x10   :  { %s174_s4 = scalar_lea.vmem %s26_s23, 64  ;;  %p179_p7 = scmp.lt.s32.totalorder %s26_s23, %s26_s23 }
  0x11   :  { %p175_p6 = scmp.ne.s32.totalorder %s26_s23, %s174_s4  ;;  %p180_p8 = scmp.lt.s32.totalorder %s174_s4, %s174_s4 }
  0x13   :  { %p181_p9 = por %p180_p8, %p179_p7 }
  0x15   :  { %p182_p10 = pnand %p181_p9, %p175_p6 }
  0x17   :  { %185 = shalt.err (!%p182_p10)
}
  0x18   :  { %28 = dma.hbm_to_vmem [thread:$0]  %s278_s1, 64, %s26_s23, [#allocation3]  }
  0x19   :  { %208 = dma.done.wait [#allocation5], 16  }
  0x1a   :  { %209 = vsyncadd [#allocation5], 4294967280 }
  0x1b   :  { %210 = dma.done.wait [#allocation3], 64  }
  0x1c   :  { %211 = vsyncadd [#allocation3], 4294967232 }
  0x1d   :  { %37 = sfence }
  0x1e   :  { %s38_s6 = sld [smem:[#allocation2]]  ;;  %s143_s7 = sld [smem:[#allocation2 + $0x1]]  ;;  %v41_v0 = vld [vmem:[#allocation6] sm:$0xf]  ;;  %v49_v3 = vld [vmem:[%s279_s2] sm:$0xf]  ;;  %v107_v25 = vlaneseq }
  0x1f   :  { %s144_s8 = sld [smem:[#allocation2 + $0x2]]  ;;  %v42_v1 = vunpack.c.0.s8 %v41_v0  ;;  %v43_v2 = vunpack.c.1.s8 %v41_v0  ;;  %v50_v4 = vunpack.c.0.s8 %v49_v3  ;;  %v51_v5 = vunpack.c.1.s8 %v49_v3  ;;  %s217_s1 = smov [#allocation7]  }
  0x20   :  { %v216_v23 = vmov 1966171168   ;;  %v108_v31 = vshrl.u32 %v107_v25, 7  ;;  %s133_s2 = sshll.u32 %s217_s1, 4  ;;  %s134_s2 = int_to_ptr.vmem [resolvable:$true] %s133_s2 }
  0x21   :  { %v44_v6 = vcvt.s32.f32 %v42_v1  ;;  %v45_v7 = vcvt.s32.f32 %v43_v2  ;;  %v52_v8 = vcvt.s32.f32 %v50_v4  ;;  %v53_v9 = vcvt.s32.f32 %v51_v5  ;;  %s186_s11 = scalar_lea.vmem %s134_s2, 64  ;;  %p191_p12 = scmp.lt.s32.totalorder %s134_s2, %s134_s2 }
  0x22   :  { %v105_v24 = vunpack.c.l.s4 %v216_v23  ;;  %p187_p11 = scmp.ne.s32.totalorder %s134_s2, %s186_s11  ;;  %p192_p13 = scmp.lt.s32.totalorder %s186_s11, %s186_s11 }
  0x24   :  { %v46_v10 = vstv %s38_s6  ;;  %v54_v11 = vstv %s143_s7  ;;  %v106_v30 = vunpack.c.0.s8 %v105_v24  ;;  %p193_p0 = por %p192_p13, %p191_p12 }
  0x25   :  { %v47_v12 = vmul.f32 %v46_v10, %v44_v6  ;;  %v48_v13 = vmul.f32 %v46_v10, %v45_v7  ;;  %v55_v14 = vmul.f32 %v54_v11, %v52_v8  ;;  %v56_v15 = vmul.f32 %v54_v11, %v53_v9 }
  0x26   :  { %v59_v16 = vstv %s144_s8  ;;  %v109_v42 = vsub.s32 %v106_v30, %v108_v31  ;;  %p194_p1 = pnand %p193_p0, %p187_p11 }
  0x27   :  { %v57_v17 = vadd.f32 %v55_v14, %v47_v12  ;;  %v58_v18 = vadd.f32 %v56_v15, %v48_v13 }
  0x29   :  { %v60_v19 = vadd.f32 %v59_v16, %v57_v17  ;;  %v61_v20 = vadd.f32 %v59_v16, %v58_v18 }
  0x2b   :  { %v148_v21 = vround.rtne.f32 %v60_v19  ;;  %v149_v22 = vround.rtne.f32 %v61_v20 }
  0x2d   :  { %v64_v26 = vmax.f32 %v148_v21, -128.0  ;;  %v65_v27 = vmax.f32 %v149_v22, -128.0 }
  0x2f   :  { %v66_v28 = vmin.f32 %v64_v26, 127.0  ;;  %v67_v29 = vmin.f32 %v65_v27, 127.0 }
  0x31   :  { %v70_v32 = vcombine.high %v66_v28, %v66_v28  ;;  %v71_v33 = vcombine.high %v67_v29, %v67_v29  ;;  %v74_v34 = vtrunc.f32 %v66_v28  ;;  %v76_v35 = vtrunc.f32 %v67_v29 }
  0x33   :  { %v75_v36 = vtrunc.f32 %v70_v32  ;;  %v77_v37 = vtrunc.f32 %v71_v33  ;;  %v78_v38 = vpack.c.f32.eXmY %v74_v34, %v74_v34, 312  ;;  %v90_v39 = vpack.c.f32.eXmY %v76_v35, %v76_v35, 312 }
  0x35   :  { %v84_v40 = vpack.c.f32.eXmY %v75_v36, %v75_v36, 312  ;;  %v96_v41 = vpack.c.f32.eXmY %v77_v37, %v77_v37, 312 }
  0x37   :  { %v145_v43 = vpack.c.b8 %v84_v40, %v78_v38  ;;  %v146_v44 = vpack.c.b8 %v96_v41, %v90_v39 }
  0x39   :  { %v110_v45 = vrot.slane %v145_v43, %v109_v42  ;;  %v117_v46 = vrot.slane %v146_v44, %v109_v42 }
  0x3b   :  { %v118_v47 = vcombine.low %v110_v45, %v117_v46 }
  0x3d   :  { %147 = vst.sshfl [vmem:[#allocation7] sm:$0x55 pattern:$0x73625140] %v118_v47 }
  0x3e   :  { %197 = shalt.err (!%p194_p1)
}
  0x3f   :  { %s198_s14 = scalar_lea.hbm %s280_s3, 64 }
  0x40   :  { %p199_p2 = scmp.ne.s32.totalorder %s280_s3, %s198_s14  ;;  %p202_p3 = scmp.lt.u32.totalorder %s198_s14, %s280_s3 }
  0x42   :  { %p204_p4 = pnand %p202_p3, %p199_p2 }
  0x44   :  { %207 = shalt.err (!%p204_p4)
}
  0x45   :  { %136 = dma.vmem_to_hbm [thread:$0]  %s134_s2, 64, %s280_s3, [#allocation4]  }
  0x46   :  { %212 = dma.done.wait [#allocation4], 64  }
  0x47   :  { %213 = vsyncadd [#allocation4], 4294967232 }
  0x48   :  { %140 = vsyncpa [#allocation3], 1 }
  0x49   :  { %141 = vsyncpa [#allocation4], 1 }
  0x4a   :  { %142 = vsyncpa [#allocation5], 1 }

</bundles_post_ra>
